<compile_context>
chip_gen: v6e
topology: v6e:2x2x1
jax: 0.10.0
libtpu: 0.0.40
codegen_flags: <defaults>
</compile_context>

<pallas_src>
import functools

import jax
import jax.numpy as jnp
from jax.experimental import pallas as pl
from jax.experimental.pallas import tpu as pltpu


def _fused_mlp_kernel(xt_ref, w_ref, b_ref, o_ref):
    # xt_ref : [8, TILE_B]   (batch on the 128-wide lane axis, full 8 sublanes)
    # w_ref  : [2, 8]        fused weight W_fused^T (resident)
    # b_ref  : [2, 1]        fused bias            (resident)
    # o_ref  : [2, TILE_B]   lane-dense, unmasked output store
    acc = jnp.dot(w_ref[...], xt_ref[...], preferred_element_type=jnp.float32)
    o_ref[...] = (acc + b_ref[...]).astype(o_ref.dtype)


@functools.partial(jax.jit, static_argnames=("tile_b",))
def _forward_impl(x0, x1, w1, b1, w2, b2, *, tile_b):
    B = x0.shape[0]

    # --- Algebraic fusion of the two Linear layers (no nonlinearity between). ---
    w_fused_t = (w1 @ w2).T                      # [2, 8]
    b_fused = (b1 @ w2 + b2).reshape(2, 1)       # [2, 1]

    # --- Single fused producer: concat + transpose -> lane-dense [8, B]. ---
    x_t = jnp.concatenate((x0, x1), axis=1).T    # [8, B]

    out_t = pl.pallas_call(
        _fused_mlp_kernel,
        out_shape=jax.ShapeDtypeStruct((2, B), x0.dtype),
        grid=(pl.cdiv(B, tile_b),),              # ragged last block is masked
        in_specs=[
            pl.BlockSpec((8, tile_b), lambda i: (0, i)),   # merged input tile
            pl.BlockSpec((2, 8), lambda i: (0, 0)),        # W_fused^T (resident)
            pl.BlockSpec((2, 1), lambda i: (0, 0)),        # fused bias (resident)
        ],
        out_specs=pl.BlockSpec((2, tile_b), lambda i: (0, i)),
        compiler_params=pltpu.CompilerParams(
            dimension_semantics=("parallel",)),
    )(x_t, w_fused_t, b_fused)

    # Back to the module's [B, 2] activation layout (tiny: B*2 elements).
    return out_t.T


def _pick_tile_b(batch, max_tile_b=65536):
    """Lane-width multiple tile; >=2 grid blocks when batch allows (v7x has 2 TCs)."""
    half_rounded = pl.cdiv(pl.cdiv(batch, 2), 128) * 128
    return int(min(max_tile_b, max(half_rounded, 128)))


def global_model_phishing_forward(input_list, params, *, max_tile_b=65536):
    """input_list: (x0 [B,4], x1 [B,4]); params: dict with w1,b1,w2,b2."""
    x0, x1 = input_list
    tile_b = _pick_tile_b(x0.shape[0], max_tile_b)
    return _forward_impl(x0, x1, params["w1"], params["b1"],
                         params["w2"], params["b2"], tile_b=tile_b)


def init_params(key):
    """Deterministic init mirroring nn.Linear shapes (Kaiming-uniform-like range)."""
    k1, k2, k3, k4 = jax.random.split(key, 4)
    bound1 = 1.0 / jnp.sqrt(8.0)
    bound2 = 1.0 / jnp.sqrt(4.0)
    return {
        # stored as [in, out] (transpose of PyTorch's [out, in]) for x @ W
        "w1": jax.random.uniform(k1, (8, 4), jnp.float32, -bound1, bound1),
        "b1": jax.random.uniform(k2, (4,), jnp.float32, -bound1, bound1),
        "w2": jax.random.uniform(k3, (4, 2), jnp.float32, -bound2, bound2),
        "b2": jax.random.uniform(k4, (2,), jnp.float32, -bound2, bound2),
    }


if __name__ == "__main__":
    key = jax.random.PRNGKey(0)
    kp, kx0, kx1 = jax.random.split(key, 3)

    params = init_params(kp)

    B = 256  # small example batch; tile picker gives 2 grid blocks of 128 lanes
    x0 = jax.random.normal(kx0, (B, 4), jnp.float32)
    x1 = jax.random.normal(kx1, (B, 4), jnp.float32)

    out = global_model_phishing_forward((x0, x1), params)
    jax.block_until_ready(out)

    # Call again with the same shapes: hits the cached jit (no re-trace/compile).
    out2 = global_model_phishing_forward((x0, x1), params)
    jax.block_until_ready(out2)

    # Reference check in plain JAX (same math as the PyTorch forward).
    x_cat = jnp.concatenate((x0, x1), axis=1)
    ref = (x_cat @ params["w1"] + params["b1"]) @ params["w2"] + params["b2"]
    assert out.shape == (B, 2)
    assert jnp.allclose(out, ref, atol=1e-5, rtol=1e-4), float(
        jnp.max(jnp.abs(out - ref)))
    assert jnp.allclose(out2, ref, atol=1e-5, rtol=1e-4)

    print("KERNEL_OK")
</pallas_src>

<mosaic_0001>
module attributes {stable_mosaic.version = 11 : i64} {
  func.func @_fused_mlp_kernel(%arg0: i32, %arg1: memref<8x128xf32, #tpu.memory_space<vmem>>, %arg2: memref<2x8xf32, #tpu.memory_space<vmem>>, %arg3: memref<2x1xf32, #tpu.memory_space<vmem>>, %arg4: memref<2x128xf32, #tpu.memory_space<vmem>>) attributes {dimension_semantics = [#tpu.dimension_semantics<parallel>], iteration_bounds = array<i64: 2>, scalar_prefetch = 0 : i64, scratch_operands = 0 : i64, tpu.core_type = #tpu.core_type<tc>, window_params = [{transform_indices = @transform_0, window_bounds = array<i64: 8, 128>}, {pipeline_mode = #tpu.pipeline_mode<synchronous>, transform_indices = @transform_1, window_bounds = array<i64: 2, 8>}, {pipeline_mode = #tpu.pipeline_mode<synchronous>, transform_indices = @transform_2, window_bounds = array<i64: 2, 1>}, {transform_indices = @transform_3, window_bounds = array<i64: 2, 128>}]} {
    %c0 = arith.constant 0 : index
    %c0_0 = arith.constant 0 : index
    %0 = vector.load %arg2[%c0, %c0_0] : memref<2x8xf32, #tpu.memory_space<vmem>>, vector<2x8xf32>
    %c0_1 = arith.constant 0 : index
    %c0_2 = arith.constant 0 : index
    %1 = vector.load %arg1[%c0_1, %c0_2] : memref<8x128xf32, #tpu.memory_space<vmem>>, vector<8x128xf32>
    %cst = arith.constant dense<0.000000e+00> : vector<2x128xf32>
    %2 = tpu.matmul %0, %1, %cst {dimension_numbers = #tpu.dot_dimension_numbers<[1], [0], [0], [1], [0, 0, 1, 1], [], []>} : vector<2x8xf32>, vector<8x128xf32>, vector<2x128xf32> -> vector<2x128xf32>
    %c0_3 = arith.constant 0 : index
    %c0_4 = arith.constant 0 : index
    %3 = vector.load %arg3[%c0_3, %c0_4] : memref<2x1xf32, #tpu.memory_space<vmem>>, vector<2x1xf32>
    %4 = vector.broadcast %3 : vector<2x1xf32> to vector<2x128xf32>
    %5 = arith.addf %2, %4 : vector<2x128xf32>
    %c0_5 = arith.constant 0 : index
    %c0_6 = arith.constant 0 : index
    %6 = vector.load %arg4[%c0_5, %c0_6] : memref<2x128xf32, #tpu.memory_space<vmem>>, vector<2x128xf32>
    tpu.vector_store %arg4[%c0_5, %c0_6], %5 {strides = array<i32>} : memref<2x128xf32, #tpu.memory_space<vmem>>, vector<2x128xf32>,
    return
  }
  func.func @transform_0(%arg0: i32) -> (i32, i32) {
    %c0_i32 = arith.constant 0 : i32
    %c0_i32_0 = arith.constant 0 : i32
    return %c0_i32, %arg0 : i32, i32
  }
  func.func @transform_1(%arg0: i32) -> (i32, i32) {
    %c0_i32 = arith.constant 0 : i32
    %c0_i32_0 = arith.constant 0 : i32
    %c0_i32_1 = arith.constant 0 : i32
    return %c0_i32, %c0_i32_0 : i32, i32
  }
  func.func @transform_2(%arg0: i32) -> (i32, i32) {
    %c0_i32 = arith.constant 0 : i32
    %c0_i32_0 = arith.constant 0 : i32
    %c0_i32_1 = arith.constant 0 : i32
    return %c0_i32, %c0_i32_0 : i32, i32
  }
  func.func @transform_3(%arg0: i32) -> (i32, i32) {
    %c0_i32 = arith.constant 0 : i32
    %c0_i32_0 = arith.constant 0 : i32
    return %c0_i32, %arg0 : i32, i32
  }
}

</mosaic_0001>

<bundles_post_ra>
// kernel: _forward_impl.1
= control target key start
LH: loop header
LB: loop body
LE: loop exit
PB: predicated region body
PF: predicated region fallthrough
CT: control target
= control target key end

     0   :  { %8 = vsyncpa [#allocation3], 0  ;;  %s568_s0 = inlined_call_operand.vmem [shape: f32[8,256], index: 0, kind: input, shape index: {}]   ;;  %s569_s1 = inlined_call_operand.vmem [shape: f32[2,8], index: 1, kind: input, shape index: {}]   ;;  %s570_s2 = inlined_call_operand.vmem [shape: f32[2,1], index: 2, kind: input, shape index: {}]   ;;  %s571_s3 = inlined_call_operand.hbm [shape: f32[2,256], index: 3, kind: output, shape index: {}]  }
   0x1   :  { %10 = vsyncpa [#allocation3 + $0x1], 0  ;;  %s469_s12 = smov 0   ;;  %s471_s13 = smov 0  }
   0x2   :  { %s473_s14 = smov 0   ;;  %s475_s15 = smov 0  }
   0x3 LB: > { %s490_s16 = sadd.s32 4294967295, %s443_s15   ;;  %s322_s17 = sadd.s32 4294967294, %s443_s15   ;;  %s443_s15 = sphi %s475_s15, %s577_s15   ;;  %s439_s14 = sphi %s473_s14, %s576_s14   ;;  %s435_s13 = sphi %s471_s13, %s575_s13   ;;  %s431_s12 = sphi %s469_s12, %s574_s12  }
   0x4   : > { %s494_s18 = sadd.s32 1, %s443_s15   ;;  %s91_s19 = sadd.s32 1, %s439_s14 }
   0x5   : > { %s88_s20 = ssub.s32 %s443_s15, %s494_s18  ;;  %p101_p0 = scmp.ne.s32.totalorder %s439_s14, %s435_s13 }
   0x6   : > { %p89_p1 = scmp.eq.s32.totalorder %s88_s20, 0  ;;  %p102_p2 = scmp.eq.s32.totalorder %s490_s16, 1 }
   0x7   : > { %p107_p3 = scmp.ne.s32.totalorder %s435_s13, %s431_s12  ;;  %p108_p4 = scmp.eq.s32.totalorder %s322_s17, 1 }
   0x8   : > { %s505_s21 = scalar_select %p89_p1, %s439_s14, %s91_s19  }
   0x9   : > { %p507_p5 = por %p102_p2, %p101_p0  ;;  %p511_p6 = por %p108_p4, %p107_p3 }
   0xa   : > { %p325_p7 = scmp.ge.s32.totalorder %s443_s15, 1  ;;  %p139_p8 = scmp.lt.s32.totalorder %s443_s15, 3 }
   0xc   : > { %p140_p9 = pnand %p325_p7, %p139_p8 }
   0xd   : > { %p162_p10 = scmp.lt.s32.totalorder (!%p140_p9), %s490_s16, 1  ;;  %s159_s6 = sand.u32 (!%p140_p9), 1, %s435_s13  }
   0xe   : > { %143 = sbr.rel (%p140_p9) target bundleno = 233 (0xe9), region = 32  ;;  %s326_s7 = sshll.u32 (!%p140_p9), %s159_s6, 1 }
   0xf   : > { %s330_s8 = sshll.u32 (!%p140_p9), %s490_s16, 5  ;;  %s161_s9 = scalar_lea.vmem (!%p140_p9), [#allocation2], %s326_s7 }
  0x10   : > { %s263_s10 = sshll.u32 (!%p140_p9), %s161_s9, 4  ;;  %s533_s19 = scalar_lea.hbm (!%p140_p9), %s571_s3, %s330_s8  ;;  %s264_s10 = int_to_ptr.vmem [resolvable:$true] %s263_s10 }
  0x11   : > { %s250_s20 = scalar_lea.sflag (!%p140_p9), [#allocation3], %s159_s6  ;;  %s383_s24 = scalar_lea.vmem (!%p140_p9), %s264_s10, 32 }
  0x12   : > { %p384_p11 = scmp.ne.s32.totalorder (!%p140_p9), %s264_s10, %s383_s24  ;;  %s448_s25 = smov (!%p140_p9), [#allocation2]  }
  0x13   : > { %v445_v0 = vmov 0.0   ;;  %vm446_vm0 = vmmov 0   ;;  %v168_v1 = vld [vmem:[%s570_s2] sm:$0x3]  ;;  %s163_s26 = scalar_select %p162_p10, %s490_s16, 1  ;;  %v447_v2 = vmov 0  }
  0x14   : > { %335 = vmatprep.subr.mxu0 %v445_v0  ;;  %337 = vmatprep.mubr.msk.f32.mxu0 %vm446_vm0, %v445_v0  ;;  %v166_v3 = vld [vmem:[%s569_s1] sm:$0x3]  ;;  %vm174_vm1 = vcmask 64512   ;;  %p385_p12 = pnand %p384_p11, %p507_p5  ;;  %s387_s16 = sshll.u32 %s448_s25, 4  ;;  %s388_s16 = int_to_ptr.vmem [resolvable:$false] %s387_s16 }
  0x15   : > { %382 = vset.pattern.permute.xlu0 %v447_v2  ;;  %s327_s27 = sshll.u32 %s163_s26, 3  ;;  %s389_s26 = scalar_lea.vmem %s388_s16, 64 }
  0x16   : > { %171 = vperm.xlu0 %382, %v168_v1   ;;  %s165_s30 = scalar_lea.vmem %s568_s0, %s327_s27  ;;  %p386_p13 = pneg %p385_p12 }
  0x17   : > { %v167_v4 = vld [vmem:[%s165_s30] sm:$0xff]  ;;  %p390_p0 = scmp.lt.s32.totalorder %s264_s10, %s388_s16  ;;  %p391_p1 = scmp.lt.s32.totalorder %s389_s26, %s383_s24 }
  0x18   : > { %336 = vmatpush3.msra.mxu0 %v167_v4 }
  0x19   : > { %338 = vmatmul.mubr.msk.f32.vlgmr.msra.gmra.mxu0 %vm174_vm1, %v166_v3  ;;  %p392_p2 = por %p391_p1, %p390_p0 }
  0x1b   : > { %p393_p3 = pnand %p392_p2, %p386_p13 }
  0x91   : > { %v172_v5 = vpop.permute.xlu0 %171 }
  0xd9   : > { %v244_v6 = vpop.f32.mrf.mxu0 }
  0xda   : > { %v245_v7 = vadd.f32 %v244_v6, %v172_v5 }
  0xdb   : > { %v339_v8 = vpop.f32.mrf.mxu0 }
  0xdc   : > { %248 = vst [vmem:[%s161_s9] sm:$0x3] %v245_v7 }
  0xdd   : > { %396 = shalt.err (!%p393_p3)
}
  0xde   : > { %s397_s27 = scalar_lea.hbm %s533_s19, 32  ;;  %s401_s30 = scalar_lea.hbm %s571_s3, 64 }
  0xdf   : > { %p398_p4 = scmp.ne.s32.totalorder %s533_s19, %s397_s27  ;;  %p402_p9 = scmp.lt.s32.totalorder %s533_s19, %s571_s3 }
  0xe0   : > { %p403_p10 = scmp.lt.s32.totalorder %s401_s30, %s397_s27 }
  0xe1   : > { %p399_p7 = pnand %p398_p4, %p507_p5 }
  0xe2   : > { %p404_p11 = por %p403_p10, %p402_p9 }
  0xe3   : > { %p400_p8 = pneg %p399_p7 }
  0xe5   : > { %p405_p12 = pnand %p404_p11, %p400_p8 }
  0xe7   : > { %408 = shalt.err (!%p405_p12)
}
  0xe8   : > { %340 = dma.vmem_to_hbm [thread:$0]  (%p507_p5), %s264_s10, 32, %s533_s19, %s250_s20  }
  0xe9 PF: > { %p346_p13 = scmp.ge.s32.totalorder %s443_s15, 2  ;;  %s275_s6 = sand.u32 1, %s431_s12  }
  0xea   : > { %s276_s7 = scalar_lea.sflag [#allocation3], %s275_s6 }
  0xeb   : > { %p343_p0 = pnand %p346_p13, %p511_p6 }
  0xed   : > { %p344_p1 = pneg %p343_p0 }
  0xef   : > { %426 = dma.done.wait (%p344_p1), %s276_s7, 32  }
  0xf0   : > { %428 = vsyncadd (%p344_p1), %s276_s7, 4294967264  ;;  %p13_p2 = scmp.ge.s32.totalorder %s494_s18, 4   ;;  %s574_s12 = smov %s435_s13 }
  0xf1   : > { %s575_s13 = smov %s439_s14  ;;  %s576_s14 = smov %s505_s21 }
  0xf2   : > { %s577_s15 = smov %s494_s18  ;;  %15 = sbr.rel (!%p13_p2) target bundleno = 3 (0x3), region = 67 }
  0xf7   :  { %281 = vsyncpa [#allocation3], 1 }
  0xf8   :  { %283 = vsyncpa [#allocation3 + $0x1], 1 }

</bundles_post_ra>
